<compile_context>
chip_gen: v5e
topology: v5e:2x2
jax: 0.10.0
libtpu: 0.0.40
codegen_flags: <defaults>
</compile_context>

<pallas_src>
import jax
import jax.numpy as jnp
import numpy as np
from jax.experimental import pallas as pl
from jax.experimental.pallas import tpu as pltpu

# ----- hyperparameters (small, deterministic stand-ins for `hyperparams`) -----
N_CHANNEL = 2
DERIVATIVE = (0, 1)                        # len(hyperparams.derivative) == 2
C_GRAN = N_CHANNEL * len(DERIVATIVE)       # conv1 input channels = 4
SEQ_LEN = 16                               # raw grid length (x.shape[2])
GRANULATION = 32                           # length fed to the conv stack
N_BASIS = 7
NEG_SLOPE = 0.1                            # LeakyReLU negative_slope
BN_EPS = 1e-5

N_CONV_IN, N_CONV_IN2, N_CONV_IN3 = 8, 8, 8
KSIZE, PAD = 3, 1                          # conv k=3, stride=1, pad=1, dilation=1
N_CONV_OUT = 4                             # length after 3 conv+pool blocks (32->16->8->4)
N_FLAT_OUT = 16
OUTPUT_SIZE = 3


# ---------------------------------------------------------------------------
# Fused kernel: granulator + convlayer1..3 + fc_block1, one batch tile per step
# ---------------------------------------------------------------------------
def _leaky(y):
    return jnp.where(y >= 0, y, NEG_SLOPE * y)


def _tscnn_kernel(x_ref, p_ref,
                  w1e_ref, w1o_ref, a1_ref,
                  w2e_ref, w2o_ref, a2_ref,
                  w3e_ref, w3o_ref, a3_ref,
                  fw1_ref, fa_ref, fw2_ref, fb2_ref,
                  o_ref):
    f32 = jnp.float32
    # Granulator: single projection (S @ basis2d folded into P at init) -> (B, 128)
    h = jnp.dot(x_ref[...], p_ref[...], preferred_element_type=f32)

    def conv_block(h, we_ref, wo_ref, aff_ref, final_relu):
        aff = aff_ref[...]
        a1, c1 = aff[0:1, :], aff[1:2, :]        # conv bias + BN1 folded affine
        a2, c2 = aff[2:3, :], aff[3:4, :]        # post-pool BN2 affine
        e = jnp.dot(h, we_ref[...], preferred_element_type=f32)   # conv @ even positions
        o = jnp.dot(h, wo_ref[...], preferred_element_type=f32)   # conv @ odd  positions
        e = jnp.maximum(e * a1 + c1, 0.0)        # BN1 + (ReLU o LeakyReLU == ReLU)
        o = jnp.maximum(o * a1 + c1, 0.0)
        y = jnp.maximum(e, o)                    # MaxPool1d(k=2, s=2)
        y = y * a2 + c2                          # BN2
        # blocks 1/2: LeakyReLU; block 3: LeakyReLU o ReLU == ReLU
        return jnp.maximum(y, 0.0) if final_relu else _leaky(y)

    h = conv_block(h, w1e_ref, w1o_ref, a1_ref, False)   # (B, 128)
    h = conv_block(h, w2e_ref, w2o_ref, a2_ref, False)   # (B, 64)
    h = conv_block(h, w3e_ref, w3o_ref, a3_ref, True)    # (B, 32)

    fa = fa_ref[...]
    h = jnp.dot(h, fw1_ref[...], preferred_element_type=f32)        # Linear1 (B, 16)
    h = jnp.maximum(h * fa[0:1, :] + fa[1:2, :], 0.0)                # fb1+BN folded, ReLU
    o_ref[...] = jnp.dot(h, fw2_ref[...], preferred_element_type=f32) + fb2_ref[...]


# ---------------------------------------------------------------------------
# Parameter setup (deterministic, synthetic, PyTorch-like layouts)
# ---------------------------------------------------------------------------
def init_params(key):
    ks = jax.random.split(key, 32)
    rnd = lambda k, shp, sc=0.1: sc * jax.random.normal(k, shp, dtype=jnp.float32)
    p = {}
    p["S"] = rnd(ks[0], (SEQ_LEN, N_BASIS))                      # basis projection
    p["basis2d"] = rnd(ks[1], (N_BASIS, GRANULATION * C_GRAN))   # basis evaluation
    # Conv1d weights in PyTorch layout (C_out, C_in, K); bias (C_out,)
    p["w1"], p["b1"] = rnd(ks[2], (N_CONV_IN, C_GRAN, KSIZE)), rnd(ks[3], (N_CONV_IN,))
    p["g1a"], p["be1a"] = 1.0 + rnd(ks[4], (N_CONV_IN,)), rnd(ks[5], (N_CONV_IN,))
    p["g1b"], p["be1b"] = 1.0 + rnd(ks[6], (N_CONV_IN,)), rnd(ks[7], (N_CONV_IN,))
    p["w2"], p["b2"] = rnd(ks[8], (N_CONV_IN2, N_CONV_IN, KSIZE)), rnd(ks[9], (N_CONV_IN2,))
    p["g2a"], p["be2a"] = 1.0 + rnd(ks[10], (N_CONV_IN2,)), rnd(ks[11], (N_CONV_IN2,))
    p["g2b"], p["be2b"] = 1.0 + rnd(ks[12], (N_CONV_IN2,)), rnd(ks[13], (N_CONV_IN2,))
    p["w3"], p["b3"] = rnd(ks[14], (N_CONV_IN3, N_CONV_IN2, KSIZE)), rnd(ks[15], (N_CONV_IN3,))
    p["g3a"], p["be3a"] = 1.0 + rnd(ks[16], (N_CONV_IN3,)), rnd(ks[17], (N_CONV_IN3,))
    p["g3b"], p["be3b"] = 1.0 + rnd(ks[18], (N_CONV_IN3,)), rnd(ks[19], (N_CONV_IN3,))
    # fc block (PyTorch nn.Linear weight layout (out, in))
    p["fw1"] = rnd(ks[20], (N_FLAT_OUT, N_CONV_OUT * N_CONV_IN3))
    p["fb1"] = rnd(ks[21], (N_FLAT_OUT,))
    p["gfc"], p["befc"] = 1.0 + rnd(ks[22], (N_FLAT_OUT,)), rnd(ks[23], (N_FLAT_OUT,))
    p["fw2"] = rnd(ks[24], (OUTPUT_SIZE, N_FLAT_OUT))
    p["fb2"] = rnd(ks[25], (OUTPUT_SIZE,))
    return p


def _conv_dense_even_odd(w, l_in):
    """PyTorch Conv1d(stride=1, pad=1, dil=1) as a dense map on the (L,C)-flat
    per-sample vector; returns matrices producing even / odd output positions."""
    w = np.asarray(w, np.float32)                 # (C_out, C_in, K)
    c_out, c_in, k_size = w.shape
    l_out = l_in + 2 * PAD - (k_size - 1)
    m = np.zeros((l_in, c_in, l_out, c_out), np.float32)
    for lo in range(l_out):
        for k in range(k_size):
            li = lo - PAD + k
            if 0 <= li < l_in:
                m[li, :, lo, :] += w[:, :, k].T
    m = m.reshape(l_in * c_in, l_out, c_out)
    m_even = np.ascontiguousarray(m[:, 0::2, :]).reshape(l_in * c_in, (l_out // 2) * c_out)
    m_odd = np.ascontiguousarray(m[:, 1::2, :]).reshape(l_in * c_in, (l_out // 2) * c_out)
    return m_even, m_odd


def _conv_affine(bias, g1, be1, g2, be2, l_pool):
    """[conv bias + BN1] and [BN2] (eval mode) folded into per-element affines."""
    bias, g1, be1, g2, be2 = (np.asarray(a, np.float32) for a in (bias, g1, be1, g2, be2))
    a1 = g1 / np.sqrt(1.0 + BN_EPS)               # running_mean=0, running_var=1
    c1 = bias * a1 + be1
    a2 = g2 / np.sqrt(1.0 + BN_EPS)
    c2 = be2
    return np.stack([np.tile(a1, l_pool), np.tile(c1, l_pool),
                     np.tile(a2, l_pool), np.tile(c2, l_pool)], axis=0)


def fold_params(p):
    """Exact algebraic refactoring of the module into lane-dense kernel operands."""
    k = {}
    # Granulator: fuse projection + basis evaluation.  Synthetic basis2d columns
    # are interpreted in (L, C) order with C fastest (matches the conv matrices).
    k["P"] = np.asarray(p["S"], np.float32) @ np.asarray(p["basis2d"], np.float32)
    k["w1e"], k["w1o"] = _conv_dense_even_odd(p["w1"], GRANULATION)
    k["aff1"] = _conv_affine(p["b1"], p["g1a"], p["be1a"], p["g1b"], p["be1b"], GRANULATION // 2)
    k["w2e"], k["w2o"] = _conv_dense_even_odd(p["w2"], GRANULATION // 2)
    k["aff2"] = _conv_affine(p["b2"], p["g2a"], p["be2a"], p["g2b"], p["be2b"], GRANULATION // 4)
    k["w3e"], k["w3o"] = _conv_dense_even_odd(p["w3"], GRANULATION // 4)
    k["aff3"] = _conv_affine(p["b3"], p["g3a"], p["be3a"], p["g3b"], p["be3b"], GRANULATION // 8)
    # fc1: permute rows so our (L,C)-flat activation matches nn.Flatten's (C,L) order
    flat = N_CONV_OUT * N_CONV_IN3
    idx = np.arange(flat)
    perm = (idx % N_CONV_IN3) * N_CONV_OUT + (idx // N_CONV_IN3)
    k["fw1"] = np.asarray(p["fw1"], np.float32).T[perm, :]          # (32, 16)
    fs = np.asarray(p["gfc"], np.float32) / np.sqrt(1.0 + BN_EPS)
    ft = np.asarray(p["fb1"], np.float32) * fs + np.asarray(p["befc"], np.float32)
    k["fa"] = np.stack([fs, ft], axis=0)                            # (2, 16)
    k["fw2"] = np.asarray(p["fw2"], np.float32).T                   # (16, 3)
    k["fb2"] = np.asarray(p["fb2"], np.float32)[None, :]            # (1, 3)
    return {name: jnp.asarray(v, jnp.float32) for name, v in k.items()}


# ---------------------------------------------------------------------------
# Full forward pass: one pallas_call, batch-tiled grid
# ---------------------------------------------------------------------------
_KP_ORDER = ("P", "w1e", "w1o", "aff1", "w2e", "w2o", "aff2",
             "w3e", "w3o", "aff3", "fw1", "fa", "fw2", "fb2")


def tscnn_forward(x, kp, *, b_tile=None):
    n = x.shape[0]
    x0 = x[:, 0, :].astype(jnp.float32)              # from_torch_to_Datagrid uses channel 0
    if b_tile is None:
        b_tile = 128 if n >= 128 else -(-n // 8) * 8  # batch tile, multiple of 8
    n_pad = -(-n // b_tile) * b_tile
    if n_pad != n:
        x0 = jnp.pad(x0, ((0, n_pad - n), (0, 0)))
    weights = [kp[name] for name in _KP_ORDER]
    out = pl.pallas_call(
        _tscnn_kernel,
        out_shape=jax.ShapeDtypeStruct((n_pad, OUTPUT_SIZE), jnp.float32),
        grid=(n_pad // b_tile,),
        in_specs=[pl.BlockSpec((b_tile, SEQ_LEN), lambda i: (i, 0))]
        + [pl.BlockSpec(w.shape, lambda i: (0, 0)) for w in weights],
        out_specs=pl.BlockSpec((b_tile, OUTPUT_SIZE), lambda i: (i, 0)),
        compiler_params=pltpu.CompilerParams(dimension_semantics=("parallel",)),
    )(x0, *weights)
    return out[:n, :, None, None]                     # Lin_out.unsqueeze_(2).unsqueeze_(3)


if __name__ == "__main__":
    key = jax.random.PRNGKey(0)
    kx, kparam = jax.random.split(key)
    x = jax.random.normal(kx, (2, N_CHANNEL, SEQ_LEN), dtype=jnp.float32)
    params = init_params(kparam)
    kernel_params = fold_params(params)
    y = tscnn_forward(x, kernel_params)
    y = jax.block_until_ready(y)
    assert y.shape == (2, OUTPUT_SIZE, 1, 1), y.shape
    assert bool(jnp.all(jnp.isfinite(y)))
    print("KERNEL_OK")
</pallas_src>

<mosaic_0001>
module attributes {stable_mosaic.version = 11 : i64} {
  func.func @_tscnn_kernel(%arg0: i32, %arg1: memref<8x16xf32, #tpu.memory_space<vmem>>, %arg2: memref<16x128xf32, #tpu.memory_space<vmem>>, %arg3: memref<128x128xf32, #tpu.memory_space<vmem>>, %arg4: memref<128x128xf32, #tpu.memory_space<vmem>>, %arg5: memref<4x128xf32, #tpu.memory_space<vmem>>, %arg6: memref<128x64xf32, #tpu.memory_space<vmem>>, %arg7: memref<128x64xf32, #tpu.memory_space<vmem>>, %arg8: memref<4x64xf32, #tpu.memory_space<vmem>>, %arg9: memref<64x32xf32, #tpu.memory_space<vmem>>, %arg10: memref<64x32xf32, #tpu.memory_space<vmem>>, %arg11: memref<4x32xf32, #tpu.memory_space<vmem>>, %arg12: memref<32x16xf32, #tpu.memory_space<vmem>>, %arg13: memref<2x16xf32, #tpu.memory_space<vmem>>, %arg14: memref<16x3xf32, #tpu.memory_space<vmem>>, %arg15: memref<1x3xf32, #tpu.memory_space<vmem>>, %arg16: memref<8x3xf32, #tpu.memory_space<vmem>>) attributes {dimension_semantics = [#tpu.dimension_semantics<parallel>], iteration_bounds = array<i64: 1>, scalar_prefetch = 0 : i64, scratch_operands = 0 : i64, tpu.core_type = #tpu.core_type<tc>, window_params = [{transform_indices = @transform_0, window_bounds = array<i64: 8, 16>}, {pipeline_mode = #tpu.pipeline_mode<synchronous>, transform_indices = @transform_1, window_bounds = array<i64: 16, 128>}, {pipeline_mode = #tpu.pipeline_mode<synchronous>, transform_indices = @transform_2, window_bounds = array<i64: 128, 128>}, {pipeline_mode = #tpu.pipeline_mode<synchronous>, transform_indices = @transform_3, window_bounds = array<i64: 128, 128>}, {pipeline_mode = #tpu.pipeline_mode<synchronous>, transform_indices = @transform_4, window_bounds = array<i64: 4, 128>}, {pipeline_mode = #tpu.pipeline_mode<synchronous>, transform_indices = @transform_5, window_bounds = array<i64: 128, 64>}, {pipeline_mode = #tpu.pipeline_mode<synchronous>, transform_indices = @transform_6, window_bounds = array<i64: 128, 64>}, {pipeline_mode = #tpu.pipeline_mode<synchronous>, transform_indices = @transform_7, window_bounds = array<i64: 4, 64>}, {pipeline_mode = #tpu.pipeline_mode<synchronous>, transform_indices = @transform_8, window_bounds = array<i64: 64, 32>}, {pipeline_mode = #tpu.pipeline_mode<synchronous>, transform_indices = @transform_9, window_bounds = array<i64: 64, 32>}, {pipeline_mode = #tpu.pipeline_mode<synchronous>, transform_indices = @transform_10, window_bounds = array<i64: 4, 32>}, {pipeline_mode = #tpu.pipeline_mode<synchronous>, transform_indices = @transform_11, window_bounds = array<i64: 32, 16>}, {pipeline_mode = #tpu.pipeline_mode<synchronous>, transform_indices = @transform_12, window_bounds = array<i64: 2, 16>}, {pipeline_mode = #tpu.pipeline_mode<synchronous>, transform_indices = @transform_13, window_bounds = array<i64: 16, 3>}, {pipeline_mode = #tpu.pipeline_mode<synchronous>, transform_indices = @transform_14, window_bounds = array<i64: 1, 3>}, {transform_indices = @transform_15, window_bounds = array<i64: 8, 3>}]} {
    %c0 = arith.constant 0 : index
    %c0_0 = arith.constant 0 : index
    %0 = vector.load %arg1[%c0, %c0_0] : memref<8x16xf32, #tpu.memory_space<vmem>>, vector<8x16xf32>
    %c0_1 = arith.constant 0 : index
    %c0_2 = arith.constant 0 : index
    %1 = vector.load %arg2[%c0_1, %c0_2] : memref<16x128xf32, #tpu.memory_space<vmem>>, vector<16x128xf32>
    %cst = arith.constant dense<0.000000e+00> : vector<8x128xf32>
    %2 = tpu.matmul %0, %1, %cst {dimension_numbers = #tpu.dot_dimension_numbers<[1], [0], [0], [1], [0, 0, 1, 1], [], []>} : vector<8x16xf32>, vector<16x128xf32>, vector<8x128xf32> -> vector<8x128xf32>
    %c0_3 = arith.constant 0 : index
    %c0_4 = arith.constant 0 : index
    %3 = vector.load %arg5[%c0_3, %c0_4] : memref<4x128xf32, #tpu.memory_space<vmem>>, vector<4x128xf32>
    %4 = vector.extract_strided_slice %3 {offsets = [0, 0], sizes = [1, 128], strides = [1, 1]} : vector<4x128xf32> to vector<1x128xf32>
    %5 = vector.extract_strided_slice %3 {offsets = [1, 0], sizes = [1, 128], strides = [1, 1]} : vector<4x128xf32> to vector<1x128xf32>
    %6 = vector.extract_strided_slice %3 {offsets = [2, 0], sizes = [1, 128], strides = [1, 1]} : vector<4x128xf32> to vector<1x128xf32>
    %7 = vector.extract_strided_slice %3 {offsets = [3, 0], sizes = [1, 128], strides = [1, 1]} : vector<4x128xf32> to vector<1x128xf32>
    %c0_5 = arith.constant 0 : index
    %c0_6 = arith.constant 0 : index
    %8 = vector.load %arg3[%c0_5, %c0_6] : memref<128x128xf32, #tpu.memory_space<vmem>>, vector<128x128xf32>
    %cst_7 = arith.constant dense<0.000000e+00> : vector<8x128xf32>
    %9 = tpu.matmul %2, %8, %cst_7 {dimension_numbers = #tpu.dot_dimension_numbers<[1], [0], [0], [1], [0, 0, 1, 1], [], []>} : vector<8x128xf32>, vector<128x128xf32>, vector<8x128xf32> -> vector<8x128xf32>
    %c0_8 = arith.constant 0 : index
    %c0_9 = arith.constant 0 : index
    %10 = vector.load %arg4[%c0_8, %c0_9] : memref<128x128xf32, #tpu.memory_space<vmem>>, vector<128x128xf32>
    %cst_10 = arith.constant dense<0.000000e+00> : vector<8x128xf32>
    %11 = tpu.matmul %2, %10, %cst_10 {dimension_numbers = #tpu.dot_dimension_numbers<[1], [0], [0], [1], [0, 0, 1, 1], [], []>} : vector<8x128xf32>, vector<128x128xf32>, vector<8x128xf32> -> vector<8x128xf32>
    %12 = vector.broadcast %4 : vector<1x128xf32> to vector<8x128xf32>
    %13 = arith.mulf %9, %12 : vector<8x128xf32>
    %14 = vector.broadcast %5 : vector<1x128xf32> to vector<8x128xf32>
    %15 = arith.addf %13, %14 : vector<8x128xf32>
    %cst_11 = arith.constant 0.000000e+00 : f32
    %16 = vector.broadcast %cst_11 : f32 to vector<8x128xf32>
    %17 = arith.maximumf %15, %16 : vector<8x128xf32>
    %18 = vector.broadcast %4 : vector<1x128xf32> to vector<8x128xf32>
    %19 = arith.mulf %11, %18 : vector<8x128xf32>
    %20 = vector.broadcast %5 : vector<1x128xf32> to vector<8x128xf32>
    %21 = arith.addf %19, %20 : vector<8x128xf32>
    %cst_12 = arith.constant 0.000000e+00 : f32
    %22 = vector.broadcast %cst_12 : f32 to vector<8x128xf32>
    %23 = arith.maximumf %21, %22 : vector<8x128xf32>
    %24 = arith.maximumf %17, %23 : vector<8x128xf32>
    %25 = vector.broadcast %6 : vector<1x128xf32> to vector<8x128xf32>
    %26 = arith.mulf %24, %25 : vector<8x128xf32>
    %27 = vector.broadcast %7 : vector<1x128xf32> to vector<8x128xf32>
    %28 = arith.addf %26, %27 : vector<8x128xf32>
    %cst_13 = arith.constant 0.000000e+00 : f32
    %29 = vector.broadcast %cst_13 : f32 to vector<8x128xf32>
    %30 = arith.cmpf oge, %28, %29 : vector<8x128xf32>
    %cst_14 = arith.constant 1.000000e-01 : f32
    %31 = vector.broadcast %cst_14 : f32 to vector<8x128xf32>
    %32 = arith.mulf %31, %28 : vector<8x128xf32>
    %33 = arith.select %30, %28, %32 : vector<8x128xi1>, vector<8x128xf32>
    %c0_15 = arith.constant 0 : index
    %c0_16 = arith.constant 0 : index
    %34 = vector.load %arg8[%c0_15, %c0_16] : memref<4x64xf32, #tpu.memory_space<vmem>>, vector<4x64xf32>
    %35 = vector.extract_strided_slice %34 {offsets = [0, 0], sizes = [1, 64], strides = [1, 1]} : vector<4x64xf32> to vector<1x64xf32>
    %36 = vector.extract_strided_slice %34 {offsets = [1, 0], sizes = [1, 64], strides = [1, 1]} : vector<4x64xf32> to vector<1x64xf32>
    %37 = vector.extract_strided_slice %34 {offsets = [2, 0], sizes = [1, 64], strides = [1, 1]} : vector<4x64xf32> to vector<1x64xf32>
    %38 = vector.extract_strided_slice %34 {offsets = [3, 0], sizes = [1, 64], strides = [1, 1]} : vector<4x64xf32> to vector<1x64xf32>
    %c0_17 = arith.constant 0 : index
    %c0_18 = arith.constant 0 : index
    %39 = vector.load %arg6[%c0_17, %c0_18] : memref<128x64xf32, #tpu.memory_space<vmem>>, vector<128x64xf32>
    %cst_19 = arith.constant dense<0.000000e+00> : vector<8x64xf32>
    %40 = tpu.matmul %33, %39, %cst_19 {dimension_numbers = #tpu.dot_dimension_numbers<[1], [0], [0], [1], [0, 0, 1, 1], [], []>} : vector<8x128xf32>, vector<128x64xf32>, vector<8x64xf32> -> vector<8x64xf32>
    %c0_20 = arith.constant 0 : index
    %c0_21 = arith.constant 0 : index
    %41 = vector.load %arg7[%c0_20, %c0_21] : memref<128x64xf32, #tpu.memory_space<vmem>>, vector<128x64xf32>
    %cst_22 = arith.constant dense<0.000000e+00> : vector<8x64xf32>
    %42 = tpu.matmul %33, %41, %cst_22 {dimension_numbers = #tpu.dot_dimension_numbers<[1], [0], [0], [1], [0, 0, 1, 1], [], []>} : vector<8x128xf32>, vector<128x64xf32>, vector<8x64xf32> -> vector<8x64xf32>
    %43 = vector.broadcast %35 : vector<1x64xf32> to vector<8x64xf32>
    %44 = arith.mulf %40, %43 : vector<8x64xf32>
    %45 = vector.broadcast %36 : vector<1x64xf32> to vector<8x64xf32>
    %46 = arith.addf %44, %45 : vector<8x64xf32>
    %cst_23 = arith.constant 0.000000e+00 : f32
    %47 = vector.broadcast %cst_23 : f32 to vector<8x64xf32>
    %48 = arith.maximumf %46, %47 : vector<8x64xf32>
    %49 = vector.broadcast %35 : vector<1x64xf32> to vector<8x64xf32>
    %50 = arith.mulf %42, %49 : vector<8x64xf32>
    %51 = vector.broadcast %36 : vector<1x64xf32> to vector<8x64xf32>
    %52 = arith.addf %50, %51 : vector<8x64xf32>
    %cst_24 = arith.constant 0.000000e+00 : f32
    %53 = vector.broadcast %cst_24 : f32 to vector<8x64xf32>
    %54 = arith.maximumf %52, %53 : vector<8x64xf32>
    %55 = arith.maximumf %48, %54 : vector<8x64xf32>
    %56 = vector.broadcast %37 : vector<1x64xf32> to vector<8x64xf32>
    %57 = arith.mulf %55, %56 : vector<8x64xf32>
    %58 = vector.broadcast %38 : vector<1x64xf32> to vector<8x64xf32>
    %59 = arith.addf %57, %58 : vector<8x64xf32>
    %cst_25 = arith.constant 0.000000e+00 : f32
    %60 = vector.broadcast %cst_25 : f32 to vector<8x64xf32>
    %61 = arith.cmpf oge, %59, %60 : vector<8x64xf32>
    %cst_26 = arith.constant 1.000000e-01 : f32
    %62 = vector.broadcast %cst_26 : f32 to vector<8x64xf32>
    %63 = arith.mulf %62, %59 : vector<8x64xf32>
    %64 = arith.select %61, %59, %63 : vector<8x64xi1>, vector<8x64xf32>
    %c0_27 = arith.constant 0 : index
    %c0_28 = arith.constant 0 : index
    %65 = vector.load %arg11[%c0_27, %c0_28] : memref<4x32xf32, #tpu.memory_space<vmem>>, vector<4x32xf32>
    %66 = vector.extract_strided_slice %65 {offsets = [0, 0], sizes = [1, 32], strides = [1, 1]} : vector<4x32xf32> to vector<1x32xf32>
    %67 = vector.extract_strided_slice %65 {offsets = [1, 0], sizes = [1, 32], strides = [1, 1]} : vector<4x32xf32> to vector<1x32xf32>
    %68 = vector.extract_strided_slice %65 {offsets = [2, 0], sizes = [1, 32], strides = [1, 1]} : vector<4x32xf32> to vector<1x32xf32>
    %69 = vector.extract_strided_slice %65 {offsets = [3, 0], sizes = [1, 32], strides = [1, 1]} : vector<4x32xf32> to vector<1x32xf32>
    %c0_29 = arith.constant 0 : index
    %c0_30 = arith.constant 0 : index
    %70 = vector.load %arg9[%c0_29, %c0_30] : memref<64x32xf32, #tpu.memory_space<vmem>>, vector<64x32xf32>
    %cst_31 = arith.constant dense<0.000000e+00> : vector<8x32xf32>
    %71 = tpu.matmul %64, %70, %cst_31 {dimension_numbers = #tpu.dot_dimension_numbers<[1], [0], [0], [1], [0, 0, 1, 1], [], []>} : vector<8x64xf32>, vector<64x32xf32>, vector<8x32xf32> -> vector<8x32xf32>
    %c0_32 = arith.constant 0 : index
    %c0_33 = arith.constant 0 : index
    %72 = vector.load %arg10[%c0_32, %c0_33] : memref<64x32xf32, #tpu.memory_space<vmem>>, vector<64x32xf32>
    %cst_34 = arith.constant dense<0.000000e+00> : vector<8x32xf32>
    %73 = tpu.matmul %64, %72, %cst_34 {dimension_numbers = #tpu.dot_dimension_numbers<[1], [0], [0], [1], [0, 0, 1, 1], [], []>} : vector<8x64xf32>, vector<64x32xf32>, vector<8x32xf32> -> vector<8x32xf32>
    %74 = vector.broadcast %66 : vector<1x32xf32> to vector<8x32xf32>
    %75 = arith.mulf %71, %74 : vector<8x32xf32>
    %76 = vector.broadcast %67 : vector<1x32xf32> to vector<8x32xf32>
    %77 = arith.addf %75, %76 : vector<8x32xf32>
    %cst_35 = arith.constant 0.000000e+00 : f32
    %78 = vector.broadcast %cst_35 : f32 to vector<8x32xf32>
    %79 = arith.maximumf %77, %78 : vector<8x32xf32>
    %80 = vector.broadcast %66 : vector<1x32xf32> to vector<8x32xf32>
    %81 = arith.mulf %73, %80 : vector<8x32xf32>
    %82 = vector.broadcast %67 : vector<1x32xf32> to vector<8x32xf32>
    %83 = arith.addf %81, %82 : vector<8x32xf32>
    %cst_36 = arith.constant 0.000000e+00 : f32
    %84 = vector.broadcast %cst_36 : f32 to vector<8x32xf32>
    %85 = arith.maximumf %83, %84 : vector<8x32xf32>
    %86 = arith.maximumf %79, %85 : vector<8x32xf32>
    %87 = vector.broadcast %68 : vector<1x32xf32> to vector<8x32xf32>
    %88 = arith.mulf %86, %87 : vector<8x32xf32>
    %89 = vector.broadcast %69 : vector<1x32xf32> to vector<8x32xf32>
    %90 = arith.addf %88, %89 : vector<8x32xf32>
    %cst_37 = arith.constant 0.000000e+00 : f32
    %91 = vector.broadcast %cst_37 : f32 to vector<8x32xf32>
    %92 = arith.maximumf %90, %91 : vector<8x32xf32>
    %c0_38 = arith.constant 0 : index
    %c0_39 = arith.constant 0 : index
    %93 = vector.load %arg13[%c0_38, %c0_39] : memref<2x16xf32, #tpu.memory_space<vmem>>, vector<2x16xf32>
    %c0_40 = arith.constant 0 : index
    %c0_41 = arith.constant 0 : index
    %94 = vector.load %arg12[%c0_40, %c0_41] : memref<32x16xf32, #tpu.memory_space<vmem>>, vector<32x16xf32>
    %cst_42 = arith.constant dense<0.000000e+00> : vector<8x16xf32>
    %95 = tpu.matmul %92, %94, %cst_42 {dimension_numbers = #tpu.dot_dimension_numbers<[1], [0], [0], [1], [0, 0, 1, 1], [], []>} : vector<8x32xf32>, vector<32x16xf32>, vector<8x16xf32> -> vector<8x16xf32>
    %96 = vector.extract_strided_slice %93 {offsets = [0, 0], sizes = [1, 16], strides = [1, 1]} : vector<2x16xf32> to vector<1x16xf32>
    %97 = vector.broadcast %96 : vector<1x16xf32> to vector<8x16xf32>
    %98 = arith.mulf %95, %97 : vector<8x16xf32>
    %99 = vector.extract_strided_slice %93 {offsets = [1, 0], sizes = [1, 16], strides = [1, 1]} : vector<2x16xf32> to vector<1x16xf32>
    %100 = vector.broadcast %99 : vector<1x16xf32> to vector<8x16xf32>
    %101 = arith.addf %98, %100 : vector<8x16xf32>
    %cst_43 = arith.constant 0.000000e+00 : f32
    %102 = vector.broadcast %cst_43 : f32 to vector<8x16xf32>
    %103 = arith.maximumf %101, %102 : vector<8x16xf32>
    %c0_44 = arith.constant 0 : index
    %c0_45 = arith.constant 0 : index
    %104 = vector.load %arg14[%c0_44, %c0_45] : memref<16x3xf32, #tpu.memory_space<vmem>>, vector<16x3xf32>
    %cst_46 = arith.constant dense<0.000000e+00> : vector<8x3xf32>
    %105 = tpu.matmul %103, %104, %cst_46 {dimension_numbers = #tpu.dot_dimension_numbers<[1], [0], [0], [1], [0, 0, 1, 1], [], []>} : vector<8x16xf32>, vector<16x3xf32>, vector<8x3xf32> -> vector<8x3xf32>
    %c0_47 = arith.constant 0 : index
    %c0_48 = arith.constant 0 : index
    %106 = vector.load %arg15[%c0_47, %c0_48] : memref<1x3xf32, #tpu.memory_space<vmem>>, vector<1x3xf32>
    %107 = vector.broadcast %106 : vector<1x3xf32> to vector<8x3xf32>
    %108 = arith.addf %105, %107 : vector<8x3xf32>
    %c0_49 = arith.constant 0 : index
    %c0_50 = arith.constant 0 : index
    %109 = vector.load %arg16[%c0_49, %c0_50] : memref<8x3xf32, #tpu.memory_space<vmem>>, vector<8x3xf32>
    tpu.vector_store %arg16[%c0_49, %c0_50], %108 {strides = array<i32>} : memref<8x3xf32, #tpu.memory_space<vmem>>, vector<8x3xf32>,
    return
  }
  func.func @transform_0(%arg0: i32) -> (i32, i32) {
    %c0_i32 = arith.constant 0 : i32
    %c0_i32_0 = arith.constant 0 : i32
    return %arg0, %c0_i32 : i32, i32
  }
  func.func @transform_1(%arg0: i32) -> (i32, i32) {
    %c0_i32 = arith.constant 0 : i32
    %c0_i32_0 = arith.constant 0 : i32
    %c0_i32_1 = arith.constant 0 : i32
    return %c0_i32, %c0_i32_0 : i32, i32
  }
  func.func @transform_2(%arg0: i32) -> (i32, i32) {
    %c0_i32 = arith.constant 0 : i32
    %c0_i32_0 = arith.constant 0 : i32
    %c0_i32_1 = arith.constant 0 : i32
    return %c0_i32, %c0_i32_0 : i32, i32
  }
  func.func @transform_3(%arg0: i32) -> (i32, i32) {
    %c0_i32 = arith.constant 0 : i32
    %c0_i32_0 = arith.constant 0 : i32
    %c0_i32_1 = arith.constant 0 : i32
    return %c0_i32, %c0_i32_0 : i32, i32
  }
  func.func @transform_4(%arg0: i32) -> (i32, i32) {
    %c0_i32 = arith.constant 0 : i32
    %c0_i32_0 = arith.constant 0 : i32
    %c0_i32_1 = arith.constant 0 : i32
    return %c0_i32, %c0_i32_0 : i32, i32
  }
  func.func @transform_5(%arg0: i32) -> (i32, i32) {
    %c0_i32 = arith.constant 0 : i32
    %c0_i32_0 = arith.constant 0 : i32
    %c0_i32_1 = arith.constant 0 : i32
    return %c0_i32, %c0_i32_0 : i32, i32
  }
  func.func @transform_6(%arg0: i32) -> (i32, i32) {
    %c0_i32 = arith.constant 0 : i32
    %c0_i32_0 = arith.constant 0 : i32
    %c0_i32_1 = arith.constant 0 : i32
    return %c0_i32, %c0_i32_0 : i32, i32
  }
  func.func @transform_7(%arg0: i32) -> (i32, i32) {
    %c0_i32 = arith.constant 0 : i32
    %c0_i32_0 = arith.constant 0 : i32
    %c0_i32_1 = arith.constant 0 : i32
    return %c0_i32, %c0_i32_0 : i32, i32
  }
  func.func @transform_8(%arg0: i32) -> (i32, i32) {
    %c0_i32 = arith.constant 0 : i32
    %c0_i32_0 = arith.constant 0 : i32
    %c0_i32_1 = arith.constant 0 : i32
    return %c0_i32, %c0_i32_0 : i32, i32
  }
  func.func @transform_9(%arg0: i32) -> (i32, i32) {
    %c0_i32 = arith.constant 0 : i32
    %c0_i32_0 = arith.constant 0 : i32
    %c0_i32_1 = arith.constant 0 : i32
    return %c0_i32, %c0_i32_0 : i32, i32
  }
  func.func @transform_10(%arg0: i32) -> (i32, i32) {
    %c0_i32 = arith.constant 0 : i32
    %c0_i32_0 = arith.constant 0 : i32
    %c0_i32_1 = arith.constant 0 : i32
    return %c0_i32, %c0_i32_0 : i32, i32
  }
  func.func @transform_11(%arg0: i32) -> (i32, i32) {
    %c0_i32 = arith.constant 0 : i32
    %c0_i32_0 = arith.constant 0 : i32
    %c0_i32_1 = arith.constant 0 : i32
    return %c0_i32, %c0_i32_0 : i32, i32
  }
  func.func @transform_12(%arg0: i32) -> (i32, i32) {
    %c0_i32 = arith.constant 0 : i32
    %c0_i32_0 = arith.constant 0 : i32
    %c0_i32_1 = arith.constant 0 : i32
    return %c0_i32, %c0_i32_0 : i32, i32
  }
  func.func @transform_13(%arg0: i32) -> (i32, i32) {
    %c0_i32 = arith.constant 0 : i32
    %c0_i32_0 = arith.constant 0 : i32
    %c0_i32_1 = arith.constant 0 : i32
    return %c0_i32, %c0_i32_0 : i32, i32
  }
  func.func @transform_14(%arg0: i32) -> (i32, i32) {
    %c0_i32 = arith.constant 0 : i32
    %c0_i32_0 = arith.constant 0 : i32
    %c0_i32_1 = arith.constant 0 : i32
    return %c0_i32, %c0_i32_0 : i32, i32
  }
  func.func @transform_15(%arg0: i32) -> (i32, i32) {
    %c0_i32 = arith.constant 0 : i32
    %c0_i32_0 = arith.constant 0 : i32
    return %arg0, %c0_i32 : i32, i32
  }
}

</mosaic_0001>

<bundles_post_ra>
// kernel: tpu_custom_call.1
= control target key start
LH: loop header
LB: loop body
LE: loop exit
PB: predicated region body
PF: predicated region fallthrough
CT: control target
= control target key end

     0   :  { %vm53_vm0 = vcmask 130048   ;;  %vm264_vm3 = vcmask 523264   ;;  %vm335_vm4 = vcmask 261120   ;;  %vm393_vm5 = vcmask 23552   ;;  %s772_s1 = inlined_call_operand.vmem [shape: f32[16,128], index: 1, kind: input, shape index: {}]   ;;  %s773_s0 = inlined_call_operand.vmem [shape: f32[8,16], index: 0, kind: input, shape index: {}]   ;;  %s774_s2 = inlined_call_operand.vmem [shape: f32[128,128], index: 2, kind: input, shape index: {}]   ;;  %s775_s3 = inlined_call_operand.vmem [shape: f32[128,128], index: 3, kind: input, shape index: {}]   ;;  %s776_s5 = inlined_call_operand.vmem [shape: f32[128,64], index: 5, kind: input, shape index: {}]   ;;  %s777_s6 = inlined_call_operand.vmem [shape: f32[128,64], index: 6, kind: input, shape index: {}]   ;;  %s778_s4 = inlined_call_operand.vmem [shape: f32[4,128], index: 4, kind: input, shape index: {}]   ;;  %s779_s8 = inlined_call_operand.vmem [shape: f32[64,32], index: 8, kind: input, shape index: {}]   ;;  %s780_s9 = inlined_call_operand.vmem [shape: f32[64,32], index: 9, kind: input, shape index: {}]   ;;  %s781_s7 = inlined_call_operand.vmem [shape: f32[4,64], index: 7, kind: input, shape index: {}]   ;;  %s782_s11 = inlined_call_operand.vmem [shape: f32[32,16], index: 11, kind: input, shape index: {}]   ;;  %s783_s13 = inlined_call_operand.vmem [shape: f32[16,3], index: 13, kind: input, shape index: {}]   ;;  %s784_s10 = inlined_call_operand.vmem [shape: f32[4,32], index: 10, kind: input, shape index: {}]   ;;  %s785_s14 = inlined_call_operand.vmem [shape: f32[1,3], index: 14, kind: input, shape index: {}]   ;;  %s786_s12 = inlined_call_operand.vmem [shape: f32[2,16], index: 12, kind: input, shape index: {}]   ;;  %s787_s15 = inlined_call_operand.vmem [shape: f32[8,3], index: 15, kind: output, shape index: {}]  }
   0x1   :  { %v52_v0 = vld [vmem:[%s772_s1 + $0x8] sm:$0xff]  ;;  %v51_v1 = vld [vmem:[%s772_s1] sm:$0xff]  ;;  %v93_v3 = vld [vmem:[%s774_s2 + $0x78] sm:$0xff] }
   0x2   :  { %v50_v2 = vld [vmem:[%s773_s0] sm:$0xff]  ;;  %71 = vmatpush.msra.mxu0 %v52_v0  ;;  %v129_v4 = vld [vmem:[%s775_s3 + $0x78] sm:$0xff]  ;;  %v92_v5 = vld [vmem:[%s774_s2 + $0x70] sm:$0xff]  ;;  %94 = vmatpush.msra.mxu1 %v93_v3 }
   0x3   :  { %130 = vmatpush.msra.mxu2 %v129_v4  ;;  %v128_v6 = vld [vmem:[%s775_s3 + $0x70] sm:$0xff]  ;;  %v91_v7 = vld [vmem:[%s774_s2 + $0x68] sm:$0xff]  ;;  %v90_v9 = vld [vmem:[%s774_s2 + $0x60] sm:$0xff] }
   0x4   :  { %72 = vmatpush.msra.mxu0 %v51_v1  ;;  %95 = vmatpush.msra.mxu1 %v92_v5  ;;  %v127_v8 = vld [vmem:[%s775_s3 + $0x68] sm:$0xff]  ;;  %v126_v10 = vld [vmem:[%s775_s3 + $0x60] sm:$0xff]  ;;  %v89_v11 = vld [vmem:[%s774_s2 + $0x58] sm:$0xff] }
   0x5   :  { %399 = vmatmul.msk.f32.vlgmr.msra.gmra.mxu0 %vm53_vm0, %v50_v2  ;;  %131 = vmatpush.msra.mxu2 %v128_v6  ;;  %v125_v12 = vld [vmem:[%s775_s3 + $0x58] sm:$0xff]  ;;  %v88_v13 = vld [vmem:[%s774_s2 + $0x50] sm:$0xff]  ;;  %v87_v15 = vld [vmem:[%s774_s2 + $0x48] sm:$0xff] }
   0x6   :  { %96 = vmatpush.msra.mxu1 %v91_v7  ;;  %v124_v14 = vld [vmem:[%s775_s3 + $0x50] sm:$0xff]  ;;  %v123_v16 = vld [vmem:[%s775_s3 + $0x48] sm:$0xff]  ;;  %v86_v17 = vld [vmem:[%s774_s2 + $0x40] sm:$0xff] }
   0x7   :  { %132 = vmatpush.msra.mxu2 %v127_v8  ;;  %v122_v18 = vld [vmem:[%s775_s3 + $0x40] sm:$0xff]  ;;  %v85_v19 = vld [vmem:[%s774_s2 + $0x38] sm:$0xff]  ;;  %v84_v21 = vld [vmem:[%s774_s2 + $0x30] sm:$0xff] }
   0x8   :  { %97 = vmatpush.msra.mxu1 %v90_v9  ;;  %v121_v20 = vld [vmem:[%s775_s3 + $0x38] sm:$0xff]  ;;  %v120_v22 = vld [vmem:[%s775_s3 + $0x30] sm:$0xff]  ;;  %v83_v23 = vld [vmem:[%s774_s2 + $0x28] sm:$0xff] }
   0x9   :  { %133 = vmatpush.msra.mxu2 %v126_v10  ;;  %v119_v24 = vld [vmem:[%s775_s3 + $0x28] sm:$0xff]  ;;  %v82_v25 = vld [vmem:[%s774_s2 + $0x20] sm:$0xff]  ;;  %v81_v27 = vld [vmem:[%s774_s2 + $0x18] sm:$0xff] }
   0xa   :  { %98 = vmatpush.msra.mxu1 %v89_v11  ;;  %v118_v26 = vld [vmem:[%s775_s3 + $0x20] sm:$0xff]  ;;  %v117_v28 = vld [vmem:[%s775_s3 + $0x18] sm:$0xff]  ;;  %v80_v29 = vld [vmem:[%s774_s2 + $0x10] sm:$0xff] }
   0xb   :  { %134 = vmatpush.msra.mxu2 %v125_v12  ;;  %v116_v30 = vld [vmem:[%s775_s3 + $0x10] sm:$0xff]  ;;  %v79_v31 = vld [vmem:[%s774_s2 + $0x8] sm:$0xff]  ;;  %v78_v33 = vld [vmem:[%s774_s2] sm:$0xff] }
   0xc   :  { %99 = vmatpush.msra.mxu1 %v88_v13  ;;  %v115_v32 = vld [vmem:[%s775_s3 + $0x8] sm:$0xff]  ;;  %v114_v34 = vld [vmem:[%s775_s3] sm:$0xff]  ;;  %v182_v35 = vld [vmem:[%s776_s5 + $0x78] sm:$0xff] }
   0xd   :  { %135 = vmatpush.msra.mxu2 %v124_v14  ;;  %v218_v36 = vld [vmem:[%s777_s6 + $0x78] sm:$0xff]  ;;  %v181_v37 = vld [vmem:[%s776_s5 + $0x70] sm:$0xff]  ;;  %183 = vmatpush.msra.mxu3 %v182_v35  ;;  %v180_v39 = vld [vmem:[%s776_s5 + $0x68] sm:$0xff] }
   0xe   :  { %100 = vmatpush.msra.mxu1 %v87_v15  ;;  %219 = vmatpush.msrb.mxu0 %v218_v36  ;;  %v217_v38 = vld [vmem:[%s777_s6 + $0x70] sm:$0xff]  ;;  %v216_v40 = vld [vmem:[%s777_s6 + $0x68] sm:$0xff]  ;;  %v179_v41 = vld [vmem:[%s776_s5 + $0x60] sm:$0xff] }
   0xf   :  { %136 = vmatpush.msra.mxu2 %v123_v16  ;;  %184 = vmatpush.msra.mxu3 %v181_v37  ;;  %v215_v42 = vld [vmem:[%s777_s6 + $0x60] sm:$0xff]  ;;  %v178_v43 = vld [vmem:[%s776_s5 + $0x58] sm:$0xff]  ;;  %v177_v46 = vld [vmem:[%s776_s5 + $0x50] sm:$0xff] }
  0x10   :  { %101 = vmatpush.msra.mxu1 %v86_v17  ;;  %220 = vmatpush.msrb.mxu0 %v217_v38  ;;  %v214_v44 = vld [vmem:[%s777_s6 + $0x58] sm:$0xff]  ;;  %v213_v47 = vld [vmem:[%s777_s6 + $0x50] sm:$0xff]  ;;  %v176_v48 = vld [vmem:[%s776_s5 + $0x48] sm:$0xff] }
  0x11   :  { %137 = vmatpush.msra.mxu2 %v122_v18  ;;  %185 = vmatpush.msra.mxu3 %v180_v39  ;;  %v212_v49 = vld [vmem:[%s777_s6 + $0x48] sm:$0xff]  ;;  %v175_v50 = vld [vmem:[%s776_s5 + $0x40] sm:$0xff]  ;;  %v174_v52 = vld [vmem:[%s776_s5 + $0x38] sm:$0xff] }
  0x12   :  { %102 = vmatpush.msra.mxu1 %v85_v19  ;;  %221 = vmatpush.msrb.mxu0 %v216_v40  ;;  %v211_v51 = vld [vmem:[%s777_s6 + $0x40] sm:$0xff]  ;;  %v210_v53 = vld [vmem:[%s777_s6 + $0x38] sm:$0xff]  ;;  %v173_v54 = vld [vmem:[%s776_s5 + $0x30] sm:$0xff] }
  0x13   :  { %138 = vmatpush.msra.mxu2 %v121_v20  ;;  %186 = vmatpush.msra.mxu3 %v179_v41  ;;  %v209_v55 = vld [vmem:[%s777_s6 + $0x30] sm:$0xff]  ;;  %v172_v56 = vld [vmem:[%s776_s5 + $0x28] sm:$0xff]  ;;  %v171_v58 = vld [vmem:[%s776_s5 + $0x20] sm:$0xff] }
  0x14   :  { %103 = vmatpush.msra.mxu1 %v84_v21  ;;  %222 = vmatpush.msrb.mxu0 %v215_v42  ;;  %v208_v57 = vld [vmem:[%s777_s6 + $0x28] sm:$0xff]  ;;  %v207_v59 = vld [vmem:[%s777_s6 + $0x20] sm:$0xff]  ;;  %v170_v60 = vld [vmem:[%s776_s5 + $0x18] sm:$0xff] }
  0x15   :  { %139 = vmatpush.msra.mxu2 %v120_v22  ;;  %187 = vmatpush.msra.mxu3 %v178_v43  ;;  %v206_v61 = vld [vmem:[%s777_s6 + $0x18] sm:$0xff]  ;;  %v169_v62 = vld [vmem:[%s776_s5 + $0x10] sm:$0xff]  ;;  %v168_v0 = vld [vmem:[%s776_s5 + $0x8] sm:$0xff] }
  0x16   :  { %104 = vmatpush.msra.mxu1 %v83_v23  ;;  %223 = vmatpush.msrb.mxu0 %v214_v44  ;;  %v205_v63 = vld [vmem:[%s777_s6 + $0x10] sm:$0xff]  ;;  %v204_v1 = vld [vmem:[%s777_s6 + $0x8] sm:$0xff]  ;;  %v167_v2 = vld [vmem:[%s776_s5] sm:$0xff] }
  0x17   :  { %140 = vmatpush.msra.mxu2 %v119_v24  ;;  %188 = vmatpush.msra.mxu3 %v177_v46  ;;  %v203_v3 = vld [vmem:[%s777_s6] sm:$0xff]  ;;  %v263_v22 = vld [vmem:[%s779_s8 + $0x38] sm:$0xff]  ;;  %v262_v24 = vld [vmem:[%s779_s8 + $0x30] sm:$0xff] }
  0x18   :  { %105 = vmatpush.msra.mxu1 %v82_v25  ;;  %224 = vmatpush.msrb.mxu0 %v213_v47  ;;  %v77_v4 = vld [vmem:[%s778_s4] sm:$0xf]  ;;  %v295_v23 = vld [vmem:[%s780_s9 + $0x38] sm:$0xff]  ;;  %v294_v25 = vld [vmem:[%s780_s9 + $0x30] sm:$0xff] }
  0x19   :  { %141 = vmatpush.msra.mxu2 %v118_v26  ;;  %189 = vmatpush.msra.mxu3 %v176_v48  ;;  %v150_v5 = vperm.slane %v77_v4, 0  ;;  %v152_v8 = vperm.slane %v77_v4, 1  ;;  %v159_v15 = vperm.slane %v77_v4, 2  ;;  %v161_v17 = vperm.slane %v77_v4, 3  ;;  %v261_v26 = vld [vmem:[%s779_s8 + $0x28] sm:$0xff]  ;;  %v256_v36 = vld [vmem:[%s779_s8] sm:$0xff] }
  0x1a   :  { %106 = vmatpush.msra.mxu1 %v81_v27  ;;  %225 = vmatpush.msrb.mxu0 %v212_v49  ;;  %v293_v27 = vld [vmem:[%s780_s9 + $0x28] sm:$0xff]  ;;  %v288_v37 = vld [vmem:[%s780_s9] sm:$0xff] }
  0x1b   :  { %142 = vmatpush.msra.mxu2 %v117_v28  ;;  %190 = vmatpush.msra.mxu3 %v175_v50  ;;  %v260_v28 = vld [vmem:[%s779_s8 + $0x20] sm:$0xff]  ;;  %v289_v35 = vld [vmem:[%s780_s9 + $0x8] sm:$0xff] }
  0x1c   :  { %107 = vmatpush.msra.mxu1 %v80_v29  ;;  %226 = vmatpush.msrb.mxu0 %v211_v51  ;;  %v292_v29 = vld [vmem:[%s780_s9 + $0x20] sm:$0xff] }
  0x1d   :  { %143 = vmatpush.msra.mxu2 %v116_v30  ;;  %191 = vmatpush.msra.mxu3 %v174_v52  ;;  %v259_v30 = vld [vmem:[%s779_s8 + $0x18] sm:$0xff]  ;;  %v166_v38 = vld [vmem:[%s781_s7] sm:$0xf] }
  0x1e   :  { %108 = vmatpush.msra.mxu1 %v79_v31  ;;  %227 = vmatpush.msrb.mxu0 %v210_v53  ;;  %v291_v31 = vld [vmem:[%s780_s9 + $0x18] sm:$0xff]  ;;  %v239_v39 = vperm.slane %v166_v38, 0  ;;  %v241_v41 = vperm.slane %v166_v38, 1  ;;  %v248_v49 = vperm.slane %v166_v38, 2  ;;  %v250_v51 = vperm.slane %v166_v38, 3 }
  0x1f   :  { %144 = vmatpush.msra.mxu2 %v115_v32  ;;  %192 = vmatpush.msra.mxu3 %v173_v54  ;;  %v258_v32 = vld [vmem:[%s779_s8 + $0x10] sm:$0xff] }
  0x20   :  { %109 = vmatpush.msra.mxu1 %v78_v33  ;;  %228 = vmatpush.msrb.mxu0 %v209_v55  ;;  %v290_v33 = vld [vmem:[%s780_s9 + $0x10] sm:$0xff] }
  0x21   :  { %145 = vmatpush.msra.mxu2 %v114_v34  ;;  %193 = vmatpush.msra.mxu3 %v172_v56  ;;  %v257_v34 = vld [vmem:[%s779_s8 + $0x8] sm:$0xff]  ;;  %v334_v56 = vld [vmem:[%s782_s11 + $0x18] sm:$0xff] }
  0x22   :  { %229 = vmatpush.msrb.mxu0 %v208_v57  ;;  %276 = vmatpush.msrb.mxu1 %v263_v22  ;;  %v333_v57 = vld [vmem:[%s782_s11 + $0x10] sm:$0xff]  ;;  %v404_v22 = vld [vmem:[%s785_s14] ss:$0 sm:$0xff] }
  0x23   :  { %194 = vmatpush.msra.mxu3 %v171_v58  ;;  %304 = vmatpush.msrb.mxu2 %v295_v23  ;;  %v332_v58 = vld [vmem:[%s782_s11 + $0x8] sm:$0xff] }
  0x24   :  { %230 = vmatpush.msrb.mxu0 %v207_v59  ;;  %277 = vmatpush.msrb.mxu1 %v262_v24  ;;  %v331_v59 = vld [vmem:[%s782_s11] sm:$0xff] }
  0x25   :  { %195 = vmatpush.msra.mxu3 %v170_v60  ;;  %305 = vmatpush.msrb.mxu2 %v294_v25  ;;  %v365_v60 = vld [vmem:[%s783_s13 + $0x8] sm:$0xff] }
  0x26   :  { %231 = vmatpush.msrb.mxu0 %v206_v61  ;;  %278 = vmatpush.msrb.mxu1 %v261_v26  ;;  %v255_v61 = vld [vmem:[%s784_s10] sm:$0xf] }
  0x27   :  { %196 = vmatpush.msra.mxu3 %v169_v62  ;;  %306 = vmatpush.msrb.mxu2 %v293_v27  ;;  %v316_v62 = vperm.slane %v255_v61, 0 }
  0x28   :  { %232 = vmatpush.msrb.mxu0 %v205_v63  ;;  %279 = vmatpush.msrb.mxu1 %v260_v28 }
  0x29   :  { %197 = vmatpush.msra.mxu3 %v168_v0  ;;  %307 = vmatpush.msrb.mxu2 %v292_v29 }
  0x2a   :  { %233 = vmatpush.msrb.mxu0 %v204_v1  ;;  %280 = vmatpush.msrb.mxu1 %v259_v30  ;;  %v318_v1 = vperm.slane %v255_v61, 1 }
  0x2b   :  { %198 = vmatpush.msra.mxu3 %v167_v2  ;;  %308 = vmatpush.msrb.mxu2 %v291_v31 }
  0x2c   :  { %234 = vmatpush.msrb.mxu0 %v203_v3  ;;  %281 = vmatpush.msrb.mxu1 %v258_v32 }
  0x2d   :  { %309 = vmatpush.msrb.mxu2 %v290_v33  ;;  %351 = vmatpush.msrb.mxu3 %v334_v56 }
  0x2e   :  { %282 = vmatpush.msrb.mxu1 %v257_v34  ;;  %387 = vmatpush.msra.mxu0 %v365_v60 }
  0x2f   :  { %310 = vmatpush.msrb.mxu2 %v289_v35  ;;  %352 = vmatpush.msrb.mxu3 %v333_v57 }
  0x30   :  { %283 = vmatpush.msrb.mxu1 %v256_v36 }
  0x31   :  { %311 = vmatpush.msrb.mxu2 %v288_v37  ;;  %353 = vmatpush.msrb.mxu3 %v332_v58 }
  0x33   :  { %354 = vmatpush.msrb.mxu3 %v331_v59 }
  0x82   :  { %v74_v45 = vpop.f32.mrf.mxu0 }
  0x83   :  { %110 = vmatmul.f32.vlgmr.msra.gmra.mxu1 %v74_v45  ;;  %146 = vmatmul.f32.vlgmr.msra.gmra.mxu2 %v74_v45 }
 0x100   :  { %v111_v6 = vpop.f32.mrf.mxu1 }
 0x101   :  { %v151_v7 = vmul.f32 %v150_v5, %v111_v6 }
 0x103   :  { %v153_v10 = vadd.f32 %v152_v8, %v151_v7 }
 0x105   :  { %v154_v13 = vmax.f32 %v153_v10, 0.0  ;;  %v327_v10 = vperm.slane %v255_v61, 3 }
 0x106   :  { %v147_v9 = vpop.f32.mrf.mxu2 }
 0x107   :  { %v155_v11 = vmul.f32 %v150_v5, %v147_v9 }
 0x109   :  { %v156_v12 = vadd.f32 %v155_v11, %v152_v8  ;;  %v325_v8 = vperm.slane %v255_v61, 2 }
 0x10b   :  { %v157_v14 = vmax.f32 %v156_v12, 0.0 }
 0x10d   :  { %v158_v16 = vmax.f32 %v154_v13, %v157_v14  ;;  %v364_v14 = vld [vmem:[%s783_s13] sm:$0xff] }
 0x10e   :  { %388 = vmatpush.msra.mxu0 %v364_v14 }
 0x10f   :  { %v160_v18 = vmul.f32 %v159_v15, %v158_v16  ;;  %v330_v15 = vld [vmem:[%s786_s12] sm:$0x3] }
 0x110   :  { %v359_v16 = vperm.slane %v330_v15, 0 }
 0x111   :  { %v162_v19 = vadd.f32 %v161_v17, %v160_v18  ;;  %v361_v17 = vperm.slane %v330_v15, 1 }
 0x113   :  { %vm163_vm1 = vcmp.ge.f32.partialorder %v162_v19, 0.0  ;;  %v164_v20 = vmul.f32 0.1, %v162_v19 }
 0x115   :  { %v165_v21 = vsel %vm163_vm1, %v162_v19, %v164_v20 }
 0x116   :  { %199 = vmatmul.f32.vlgmr.msra.gmra.mxu3 %v165_v21  ;;  %235 = vmatmul.f32.vlgmr.msrb.gmra.mxu0 %v165_v21 }
 0x193   :  { %v236_v40 = vpop.f32.mrf.mxu0 }
 0x194   :  { %v244_v42 = vmul.f32 %v239_v39, %v236_v40 }
 0x196   :  { %v245_v44 = vadd.f32 %v244_v42, %v241_v41 }
 0x198   :  { %v246_v47 = vmax.f32 %v245_v44, 0.0 }
 0x199   :  { %v200_v43 = vpop.f32.mrf.mxu3 }
 0x19a   :  { %v240_v45 = vmul.f32 %v239_v39, %v200_v43 }
 0x19c   :  { %v242_v46 = vadd.f32 %v241_v41, %v240_v45 }
 0x19e   :  { %v243_v48 = vmax.f32 %v242_v46, 0.0 }
 0x1a0   :  { %v247_v50 = vmax.f32 %v243_v48, %v246_v47 }
 0x1a2   :  { %v249_v52 = vmul.f32 %v248_v49, %v247_v50 }
 0x1a4   :  { %v251_v53 = vadd.f32 %v250_v51, %v249_v52 }
 0x1a6   :  { %vm252_vm2 = vcmp.ge.f32.partialorder %v251_v53, 0.0  ;;  %v253_v54 = vmul.f32 0.1, %v251_v53 }
 0x1a8   :  { %v254_v55 = vsel %vm252_vm2, %v251_v53, %v253_v54 }
 0x1a9   :  { %400 = vmatmul.msk.f32.vlgmr.msrb.gmra.mxu1 %vm264_vm3, %v254_v55  ;;  %401 = vmatmul.msk.f32.vlgmr.msrb.gmra.mxu2 %vm264_vm3, %v254_v55 }
 0x226   :  { %v285_v63 = vpop.f32.mrf.mxu1 }
 0x227   :  { %v317_v0 = vmul.f32 %v316_v62, %v285_v63 }
 0x229   :  { %v319_v3 = vadd.f32 %v318_v1, %v317_v0 }
 0x22b   :  { %v320_v6 = vmax.f32 %v319_v3, 0.0 }
 0x22c   :  { %v313_v2 = vpop.f32.mrf.mxu2 }
 0x22d   :  { %v321_v4 = vmul.f32 %v316_v62, %v313_v2 }
 0x22f   :  { %v322_v5 = vadd.f32 %v321_v4, %v318_v1 }
 0x231   :  { %v323_v7 = vmax.f32 %v322_v5, 0.0 }
 0x233   :  { %v324_v9 = vmax.f32 %v320_v6, %v323_v7 }
 0x235   :  { %v326_v11 = vmul.f32 %v325_v8, %v324_v9 }
 0x237   :  { %v328_v12 = vadd.f32 %v327_v10, %v326_v11 }
 0x239   :  { %v329_v13 = vmax.f32 %v328_v12, 0.0 }
 0x23b   :  { %402 = vmatmul.msk.f32.vlgmr.msrb.gmra.mxu3 %vm335_vm4, %v329_v13 }
 0x2be   :  { %v356_v18 = vpop.f32.mrf.mxu3 }
 0x2bf   :  { %v360_v19 = vmul.f32 %v359_v16, %v356_v18 }
 0x2c1   :  { %v362_v20 = vadd.f32 %v361_v17, %v360_v19 }
 0x2c3   :  { %v363_v21 = vmax.f32 %v362_v20, 0.0 }
 0x2c5   :  { %403 = vmatmul.msk.f32.vlgmr.msra.gmra.mxu0 %vm53_vm0, %v363_v21 }
 0x342   :  { %v390_v23 = vpop.f32.mrf.mxu0 }
 0x343   :  { %v391_v24 = vadd.f32 %v404_v22, %v390_v23 }
 0x345   :  { %394 = vst.msk [vmem:[%s787_s15] sm:$0xff] %vm393_vm5, %v391_v24 }

</bundles_post_ra>
